<compile_context>
chip_gen: v5e
topology: v5e:2x2
jax: 0.10.0
libtpu: 0.0.40
codegen_flags: <defaults>
</compile_context>

<pallas_src>
import jax
import jax.numpy as jnp
from jax.experimental import pallas as pl
from jax.experimental.pallas import tpu as pltpu

N_HID = 128
N_OUT = 8  # 3 + 5 action heads, concatenated along features


def dqn_kernel(x_ref, w1_ref, b1_ref, w2_ref, b2_ref, wh_ref, bh_ref, o_ref):
    # In-kernel f32 -> bf16 cast: the HBM input is read exactly once (f32) by
    # the Pallas DMA; the cast is a few VPU ops hidden under the matmuls.
    x = x_ref[...].astype(jnp.bfloat16)

    # Hidden layer 1: relu(x @ W1 + b1). bf16 operands, f32 MXU accumulate,
    # bf16 epilogue (result is already the next matmul's operand dtype).
    h1 = jnp.dot(x, w1_ref[...], preferred_element_type=jnp.float32)
    h1 = jnp.maximum(h1.astype(jnp.bfloat16) + b1_ref[...], 0)

    # Hidden layer 2: relu(h1 @ W2 + b2)
    h2 = jnp.dot(h1, w2_ref[...], preferred_element_type=jnp.float32)
    h2 = jnp.maximum(h2.astype(jnp.bfloat16) + b2_ref[...], 0)

    # Fused action heads (3-wide ++ 5-wide): h2 @ Wh + bh, f32 epilogue.
    out = jnp.dot(h2, wh_ref[...], preferred_element_type=jnp.float32)
    o_ref[...] = out + bh_ref[...]


def _batch_tile(B, block_b):
    """Batch tile: large enough to amortize the ~600-cycle per-grid-step
    overhead, but keep >= 4 grid steps (>= 2 per v7x TensorCore) when the
    batch allows it. Tiles smaller than the batch are multiples of 8."""
    if B <= block_b:
        if B >= 4 * 512:
            tb = ((pl.cdiv(B, 4) + 7) // 8) * 8   # >= 4 steps, 8-row aligned
            return min(tb, block_b)
        return B                                  # one full block (any size)
    return max(8, (block_b // 8) * 8)


def dqn_forward(x, params, *, block_b=2048):
    """x: [B, n_obs] float32 -> [B, 8] float32 (action_1 (3) ++ action_2 (5))."""
    w1, b1, w2, b2, wh, bh = params
    B, n_obs = x.shape
    n_out = wh.shape[1]

    tb = _batch_tile(B, block_b)
    grid = (pl.cdiv(B, tb),)

    flops = 2 * B * (n_obs * N_HID + N_HID * N_HID + N_HID * n_out)
    bytes_accessed = (
        x.size * 4                                    # f32 input, read once
        + (w1.size + w2.size + wh.size) * 2           # bf16 weights
        + (b1.size + b2.size) * 2 + bh.size * 4       # biases
        + B * n_out * 4                               # f32 output
    )

    # Weights / biases: constant block index -> fetched once, VMEM-resident.
    const2 = lambda a: pl.BlockSpec(a.shape, lambda i: (0, 0))

    return pl.pallas_call(
        dqn_kernel,
        out_shape=jax.ShapeDtypeStruct((B, n_out), jnp.float32),
        grid=grid,
        in_specs=[
            pl.BlockSpec((tb, n_obs), lambda i: (i, 0)),   # x tile moves
            const2(w1), const2(b1),
            const2(w2), const2(b2),
            const2(wh), const2(bh),
        ],
        out_specs=pl.BlockSpec((tb, n_out), lambda i: (i, 0)),
        compiler_params=pltpu.CompilerParams(
            dimension_semantics=("parallel",),             # 2-TC shard on v7x
            vmem_limit_bytes=32 * 1024 * 1024,
        ),
        cost_estimate=pl.CostEstimate(
            flops=flops, transcendentals=0, bytes_accessed=bytes_accessed),
    )(x, w1, b1, w2, b2, wh, bh)


def init_params(key, n_observations):
    """Deterministic synthetic init matching the PyTorch module's shapes.

    layer1: Linear(n_obs, 128), layer2: Linear(128, 128),
    layer_action_1: Linear(128, 3), layer_action_2: Linear(128, 5).
    Head weights/biases are concatenated along the output axis -> [128, 8].
    Weights and hidden biases are stored in bf16 once here (outside the hot
    path); the head bias stays f32 for the f32 epilogue.
    """
    k = jax.random.split(key, 8)

    def lin(kw, kb, fan_in, fan_out):
        # uniform(-1/sqrt(fan_in), 1/sqrt(fan_in)), like torch default init
        bound = 1.0 / jnp.sqrt(jnp.float32(fan_in))
        w = jax.random.uniform(kw, (fan_in, fan_out), jnp.float32, -bound, bound)
        b = jax.random.uniform(kb, (1, fan_out), jnp.float32, -bound, bound)
        return w, b

    w1, b1 = lin(k[0], k[1], n_observations, N_HID)
    w2, b2 = lin(k[2], k[3], N_HID, N_HID)
    wa1, ba1 = lin(k[4], k[5], N_HID, 3)
    wa2, ba2 = lin(k[6], k[7], N_HID, 5)
    wh = jnp.concatenate([wa1, wa2], axis=1)   # [128, 8]
    bh = jnp.concatenate([ba1, ba2], axis=1)   # [1, 8]
    return (w1.astype(jnp.bfloat16), b1.astype(jnp.bfloat16),
            w2.astype(jnp.bfloat16), b2.astype(jnp.bfloat16),
            wh.astype(jnp.bfloat16), bh)


def dqn_reference(x, params):
    """Pure-JAX reference with the identical bf16-operand / f32-accumulate /
    bf16-epilogue recipe used in the kernel."""
    w1, b1, w2, b2, wh, bh = params
    xb = x.astype(jnp.bfloat16)
    h1 = jnp.maximum(
        jnp.dot(xb, w1, preferred_element_type=jnp.float32
                ).astype(jnp.bfloat16) + b1, 0)
    h2 = jnp.maximum(
        jnp.dot(h1, w2, preferred_element_type=jnp.float32
                ).astype(jnp.bfloat16) + b2, 0)
    return jnp.dot(h2, wh, preferred_element_type=jnp.float32) + bh


if __name__ == "__main__":
    key = jax.random.PRNGKey(0)
    k_param, k_x, k_x2, k_x3 = jax.random.split(key, 4)

    n_observations = 12   # Env(12) -> len(state) == 12
    batch = 2

    params = init_params(k_param, n_observations)

    # Small single-tile case (matches the original batch=2 usage).
    x = jax.random.normal(k_x, (batch, n_observations), jnp.float32)
    out = jax.block_until_ready(jax.jit(dqn_forward)(x, params))
    ref = dqn_reference(x, params)
    assert out.shape == (batch, N_OUT), out.shape
    assert jnp.allclose(out, ref, atol=2e-2, rtol=2e-2), "mismatch (B=2)"

    # Multi-tile with a partial (masked) last batch block: B=20, tb=8 -> 3 steps.
    x2 = jax.random.normal(k_x2, (20, n_observations), jnp.float32)
    out2 = jax.block_until_ready(
        jax.jit(lambda a, p: dqn_forward(a, p, block_b=8))(x2, params))
    ref2 = dqn_reference(x2, params)
    assert out2.shape == (20, N_OUT), out2.shape
    assert jnp.allclose(out2, ref2, atol=2e-2, rtol=2e-2), "mismatch (B=20)"

    # Larger batch exercising the >=4-grid-step split (tb=512, grid=4).
    x3 = jax.random.normal(k_x3, (2048, n_observations), jnp.float32)
    out3 = jax.block_until_ready(jax.jit(dqn_forward)(x3, params))
    ref3 = dqn_reference(x3, params)
    assert out3.shape == (2048, N_OUT), out3.shape
    assert jnp.allclose(out3, ref3, atol=2e-2, rtol=2e-2), "mismatch (B=2048)"

    print("KERNEL_OK")
</pallas_src>

<mosaic_0001>
module attributes {stable_mosaic.version = 11 : i64} {
  func.func @dqn_kernel(%arg0: i32, %arg1: memref<2x12xf32, #tpu.memory_space<vmem>>, %arg2: memref<12x128xbf16, #tpu.memory_space<vmem>>, %arg3: memref<1x128xbf16, #tpu.memory_space<vmem>>, %arg4: memref<128x128xbf16, #tpu.memory_space<vmem>>, %arg5: memref<1x128xbf16, #tpu.memory_space<vmem>>, %arg6: memref<128x8xbf16, #tpu.memory_space<vmem>>, %arg7: memref<1x8xf32, #tpu.memory_space<vmem>>, %arg8: memref<2x8xf32, #tpu.memory_space<vmem>>) attributes {dimension_semantics = [#tpu.dimension_semantics<parallel>], iteration_bounds = array<i64: 1>, scalar_prefetch = 0 : i64, scratch_operands = 0 : i64, tpu.core_type = #tpu.core_type<tc>, window_params = [{transform_indices = @transform_0, window_bounds = array<i64: 2, 12>}, {pipeline_mode = #tpu.pipeline_mode<synchronous>, transform_indices = @transform_1, window_bounds = array<i64: 12, 128>}, {pipeline_mode = #tpu.pipeline_mode<synchronous>, transform_indices = @transform_2, window_bounds = array<i64: 1, 128>}, {pipeline_mode = #tpu.pipeline_mode<synchronous>, transform_indices = @transform_3, window_bounds = array<i64: 128, 128>}, {pipeline_mode = #tpu.pipeline_mode<synchronous>, transform_indices = @transform_4, window_bounds = array<i64: 1, 128>}, {pipeline_mode = #tpu.pipeline_mode<synchronous>, transform_indices = @transform_5, window_bounds = array<i64: 128, 8>}, {pipeline_mode = #tpu.pipeline_mode<synchronous>, transform_indices = @transform_6, window_bounds = array<i64: 1, 8>}, {transform_indices = @transform_7, window_bounds = array<i64: 2, 8>}]} {
    %c0 = arith.constant 0 : index
    %c0_0 = arith.constant 0 : index
    %0 = vector.load %arg1[%c0, %c0_0] : memref<2x12xf32, #tpu.memory_space<vmem>>, vector<2x12xf32>
    %1 = arith.truncf %0 : vector<2x12xf32> to vector<2x12xbf16>
    %c0_1 = arith.constant 0 : index
    %c0_2 = arith.constant 0 : index
    %2 = vector.load %arg2[%c0_1, %c0_2] : memref<12x128xbf16, #tpu.memory_space<vmem>>, vector<12x128xbf16>
    %cst = arith.constant dense<0.000000e+00> : vector<2x128xf32>
    %3 = tpu.matmul %1, %2, %cst {dimension_numbers = #tpu.dot_dimension_numbers<[1], [0], [0], [1], [0, 0, 1, 1], [], []>} : vector<2x12xbf16>, vector<12x128xbf16>, vector<2x128xf32> -> vector<2x128xf32>
    %4 = arith.truncf %3 : vector<2x128xf32> to vector<2x128xbf16>
    %c0_3 = arith.constant 0 : index
    %c0_4 = arith.constant 0 : index
    %5 = vector.load %arg3[%c0_3, %c0_4] : memref<1x128xbf16, #tpu.memory_space<vmem>>, vector<1x128xbf16>
    %6 = vector.broadcast %5 : vector<1x128xbf16> to vector<2x128xbf16>
    %7 = arith.addf %4, %6 : vector<2x128xbf16>
    %cst_5 = arith.constant 0.000000e+00 : bf16
    %8 = vector.broadcast %cst_5 : bf16 to vector<2x128xbf16>
    %9 = arith.maximumf %7, %8 : vector<2x128xbf16>
    %c0_6 = arith.constant 0 : index
    %c0_7 = arith.constant 0 : index
    %10 = vector.load %arg4[%c0_6, %c0_7] : memref<128x128xbf16, #tpu.memory_space<vmem>>, vector<128x128xbf16>
    %cst_8 = arith.constant dense<0.000000e+00> : vector<2x128xf32>
    %11 = tpu.matmul %9, %10, %cst_8 {dimension_numbers = #tpu.dot_dimension_numbers<[1], [0], [0], [1], [0, 0, 1, 1], [], []>} : vector<2x128xbf16>, vector<128x128xbf16>, vector<2x128xf32> -> vector<2x128xf32>
    %12 = arith.truncf %11 : vector<2x128xf32> to vector<2x128xbf16>
    %c0_9 = arith.constant 0 : index
    %c0_10 = arith.constant 0 : index
    %13 = vector.load %arg5[%c0_9, %c0_10] : memref<1x128xbf16, #tpu.memory_space<vmem>>, vector<1x128xbf16>
    %14 = vector.broadcast %13 : vector<1x128xbf16> to vector<2x128xbf16>
    %15 = arith.addf %12, %14 : vector<2x128xbf16>
    %cst_11 = arith.constant 0.000000e+00 : bf16
    %16 = vector.broadcast %cst_11 : bf16 to vector<2x128xbf16>
    %17 = arith.maximumf %15, %16 : vector<2x128xbf16>
    %c0_12 = arith.constant 0 : index
    %c0_13 = arith.constant 0 : index
    %18 = vector.load %arg6[%c0_12, %c0_13] : memref<128x8xbf16, #tpu.memory_space<vmem>>, vector<128x8xbf16>
    %cst_14 = arith.constant dense<0.000000e+00> : vector<2x8xf32>
    %19 = tpu.matmul %17, %18, %cst_14 {dimension_numbers = #tpu.dot_dimension_numbers<[1], [0], [0], [1], [0, 0, 1, 1], [], []>} : vector<2x128xbf16>, vector<128x8xbf16>, vector<2x8xf32> -> vector<2x8xf32>
    %c0_15 = arith.constant 0 : index
    %c0_16 = arith.constant 0 : index
    %20 = vector.load %arg7[%c0_15, %c0_16] : memref<1x8xf32, #tpu.memory_space<vmem>>, vector<1x8xf32>
    %21 = vector.broadcast %20 : vector<1x8xf32> to vector<2x8xf32>
    %22 = arith.addf %19, %21 : vector<2x8xf32>
    %c0_17 = arith.constant 0 : index
    %c0_18 = arith.constant 0 : index
    %23 = vector.load %arg8[%c0_17, %c0_18] : memref<2x8xf32, #tpu.memory_space<vmem>>, vector<2x8xf32>
    tpu.vector_store %arg8[%c0_17, %c0_18], %22 {strides = array<i32>} : memref<2x8xf32, #tpu.memory_space<vmem>>, vector<2x8xf32>,
    return
  }
  func.func @transform_0(%arg0: i32) -> (i32, i32) {
    %c0_i32 = arith.constant 0 : i32
    %c0_i32_0 = arith.constant 0 : i32
    return %arg0, %c0_i32 : i32, i32
  }
  func.func @transform_1(%arg0: i32) -> (i32, i32) {
    %c0_i32 = arith.constant 0 : i32
    %c0_i32_0 = arith.constant 0 : i32
    %c0_i32_1 = arith.constant 0 : i32
    return %c0_i32, %c0_i32_0 : i32, i32
  }
  func.func @transform_2(%arg0: i32) -> (i32, i32) {
    %c0_i32 = arith.constant 0 : i32
    %c0_i32_0 = arith.constant 0 : i32
    %c0_i32_1 = arith.constant 0 : i32
    return %c0_i32, %c0_i32_0 : i32, i32
  }
  func.func @transform_3(%arg0: i32) -> (i32, i32) {
    %c0_i32 = arith.constant 0 : i32
    %c0_i32_0 = arith.constant 0 : i32
    %c0_i32_1 = arith.constant 0 : i32
    return %c0_i32, %c0_i32_0 : i32, i32
  }
  func.func @transform_4(%arg0: i32) -> (i32, i32) {
    %c0_i32 = arith.constant 0 : i32
    %c0_i32_0 = arith.constant 0 : i32
    %c0_i32_1 = arith.constant 0 : i32
    return %c0_i32, %c0_i32_0 : i32, i32
  }
  func.func @transform_5(%arg0: i32) -> (i32, i32) {
    %c0_i32 = arith.constant 0 : i32
    %c0_i32_0 = arith.constant 0 : i32
    %c0_i32_1 = arith.constant 0 : i32
    return %c0_i32, %c0_i32_0 : i32, i32
  }
  func.func @transform_6(%arg0: i32) -> (i32, i32) {
    %c0_i32 = arith.constant 0 : i32
    %c0_i32_0 = arith.constant 0 : i32
    %c0_i32_1 = arith.constant 0 : i32
    return %c0_i32, %c0_i32_0 : i32, i32
  }
  func.func @transform_7(%arg0: i32) -> (i32, i32) {
    %c0_i32 = arith.constant 0 : i32
    %c0_i32_0 = arith.constant 0 : i32
    return %arg0, %c0_i32 : i32, i32
  }
}

</mosaic_0001>

<bundles_post_ra>
// kernel: dqn_forward.1
= control target key start
LH: loop header
LB: loop body
LE: loop exit
PB: predicated region body
PF: predicated region fallthrough
CT: control target
= control target key end

     0   :  { %12 = vsyncpa [#allocation3], 0  ;;  %s530_s0 = inlined_call_operand.vmem [shape: f32[2,12], index: 0, kind: input, shape index: {}]   ;;  %s531_s1 = inlined_call_operand.hbm [shape: bf16[12,128], index: 1, kind: input, shape index: {}]   ;;  %s532_s2 = inlined_call_operand.vmem [shape: bf16[1,128], index: 2, kind: input, shape index: {}]   ;;  %s533_s3 = inlined_call_operand.vmem [shape: bf16[128,128], index: 3, kind: input, shape index: {}]   ;;  %s534_s4 = inlined_call_operand.vmem [shape: bf16[1,128], index: 4, kind: input, shape index: {}]   ;;  %s535_s5 = inlined_call_operand.vmem [shape: bf16[128,8], index: 5, kind: input, shape index: {}]   ;;  %s536_s6 = inlined_call_operand.vmem [shape: f32[1,8], index: 6, kind: input, shape index: {}]   ;;  %s537_s7 = inlined_call_operand.hbm [shape: f32[2,8], index: 7, kind: output, shape index: {}]  }
   0x1   :  { %13 = vsyncpa [#allocation4], 0  ;;  %s20_s26 = sshll.u32 %s531_s1, 4  ;;  %s420_s27 = smov [#allocation2]   ;;  %s21_s26 = int_to_ptr.hbm [resolvable:$true] %s20_s26 }
   0x2   :  { %s22_s28 = sshll.u32 %s420_s27, 4  ;;  %s421_s29 = smov 64   ;;  %s23_s28 = int_to_ptr.vmem [resolvable:$true] %s22_s28 }
   0x3   :  { %s422_s30 = smov 4  }
   0x4   :  { %28 = dma.hbm_to_vmem [thread:$0]  %s21_s26, 128, %s23_s28, [#allocation3], %s421_s29, %s421_s29, %s422_s30  }
   0x5   :  { %416 = dma.done.wait [#allocation3], 128  }
   0x6   :  { %417 = vsyncadd [#allocation3], 4294967168  ;;  %vm57_vm0 = vcmask 1045504   ;;  %v279_v0 = vld [vmem:[#allocation2] sm:$0xf]  ;;  %v354_v4 = vld [vmem:[%s533_s3 + $0x38] sm:$0xff] }
   0x7   :  { %v346_v1 = vld [vmem:[#allocation2] sm:$0x30]  ;;  %v44_v2 = vld [vmem:[%s530_s0] sm:$0x3]  ;;  %151 = vmatpush.bf16.msra.mxu1 %v354_v4  ;;  %v353_v7 = vld [vmem:[%s533_s3 + $0x30] sm:$0xff]  ;;  %vm53_vm1 = vcmask 97280  }
   0x8   :  { %v280_v3 = vor.u32 %v346_v1, %v279_v0  ;;  %v45_v6 = vpack.c.bf16 %v44_v2, %v44_v2  ;;  %v352_v8 = vld [vmem:[%s533_s3 + $0x28] sm:$0xff]  ;;  %v351_v9 = vld [vmem:[%s533_s3 + $0x20] sm:$0xff]  ;;  %v350_v10 = vld [vmem:[%s533_s3 + $0x18] sm:$0xff]  ;;  %vm258_vm2 = vcmask 58368  }
   0x9   :  { %v349_v11 = vld [vmem:[%s533_s3 + $0x10] sm:$0xff]  ;;  %v348_v12 = vld [vmem:[%s533_s3 + $0x8] sm:$0xff]  ;;  %v347_v13 = vld [vmem:[%s533_s3] sm:$0xff] }
   0xa   :  { %v59_v5 = vsel %vm57_vm0, %v280_v3, 0  ;;  %v362_v14 = vld [vmem:[%s535_s5 + $0x38] sm:$0xff]  ;;  %v361_v15 = vld [vmem:[%s535_s5 + $0x30] sm:$0xff]  ;;  %v360_v16 = vld [vmem:[%s535_s5 + $0x28] sm:$0xff] }
   0xb   :  { %68 = vmatpush.bf16.msra.mxu0 %v59_v5  ;;  %152 = vmatpush.bf16.msra.mxu1 %v353_v7  ;;  %v359_v17 = vld [vmem:[%s535_s5 + $0x20] sm:$0xff]  ;;  %v358_v20 = vld [vmem:[%s535_s5 + $0x18] sm:$0xff]  ;;  %v357_v30 = vld [vmem:[%s535_s5 + $0x10] sm:$0xff] }
   0xc   :  { %245 = vmatpush.bf16.msra.mxu2 %v362_v14  ;;  %v75_v18 = vld [vmem:[%s532_s2] sm:$0x1]  ;;  %v356_v31 = vld [vmem:[%s535_s5 + $0x8] sm:$0xff] }
   0xd   :  { %v77_v19 = vpack.i.b16 %v75_v18, %v75_v18  ;;  %v355_v32 = vld [vmem:[%s535_s5] sm:$0xff]  ;;  %s423_s5 = smov [#allocation5]  }
   0xe   :  { %281 = vmatmul.msk.bf16.vlgmr.msra.gmra.mxu0 %vm53_vm1, %v45_v6  ;;  %v165_v33 = vld [vmem:[%s534_s4] sm:$0x1]  ;;  %s265_s19 = sshll.u32 %s423_s5, 4  ;;  %s267_s4 = sshll.u32 %s537_s7, 4  ;;  %s266_s19 = int_to_ptr.vmem [resolvable:$true] %s265_s19  ;;  %s268_s4 = int_to_ptr.hbm [resolvable:$true] %s267_s4 }
   0xf   :  { %153 = vmatpush.bf16.msra.mxu1 %v352_v8  ;;  %v79_v21 = vperm.slane %v77_v19, 0  ;;  %v167_v34 = vpack.i.b16 %v165_v33, %v165_v33  ;;  %v367_v44 = vld [vmem:[%s536_s6] ss:$0 sm:$0xff] }
  0x10   :  { %246 = vmatpush.bf16.msra.mxu2 %v361_v15 }
  0x11   :  { %v81_v24 = vunpack.c.l.bf16 %v79_v21  ;;  %v169_v35 = vperm.slane %v167_v34, 0 }
  0x13   :  { %154 = vmatpush.bf16.msra.mxu1 %v351_v9  ;;  %v171_v38 = vunpack.c.l.bf16 %v169_v35 }
  0x14   :  { %247 = vmatpush.bf16.msra.mxu2 %v360_v16 }
  0x17   :  { %155 = vmatpush.bf16.msra.mxu1 %v350_v10 }
  0x18   :  { %248 = vmatpush.bf16.msra.mxu2 %v359_v17 }
  0x1b   :  { %156 = vmatpush.bf16.msra.mxu1 %v349_v11 }
  0x1c   :  { %249 = vmatpush.bf16.msra.mxu2 %v358_v20 }
  0x1f   :  { %157 = vmatpush.bf16.msra.mxu1 %v348_v12 }
  0x20   :  { %250 = vmatpush.bf16.msra.mxu2 %v357_v30 }
  0x23   :  { %158 = vmatpush.bf16.msra.mxu1 %v347_v13 }
  0x24   :  { %251 = vmatpush.bf16.msra.mxu2 %v356_v31 }
  0x28   :  { %252 = vmatpush.bf16.msra.mxu2 %v355_v32 }
  0x8b   :  { %v70_v22 = vpop.f32.mrf.mxu0 }
  0x8c   :  { %v74_v23 = vpack.c.bf16 %v70_v22, %v70_v22 }
  0x8e   :  { %v80_v25 = vunpack.c.l.bf16 %v74_v23 }
  0x90   :  { %v82_v26 = vadd.f32 %v81_v24, %v80_v25 }
  0x92   :  { %v85_v27 = vmax.f32 %v82_v26, 0.0 }
  0x93   :  { %v72_v28 = vpop.f32.mrf.mxu0 }
  0x94   :  { %v86_v29 = vpack.c.bf16 %v85_v27, %v85_v27 }
  0x96   :  { %159 = vmatmul.bf16.vlgmr.msra.gmra.mxu1 %v86_v29 }
 0x113   :  { %v160_v36 = vpop.f32.mrf.mxu1 }
 0x114   :  { %v164_v37 = vpack.c.bf16 %v160_v36, %v160_v36 }
 0x116   :  { %v170_v39 = vunpack.c.l.bf16 %v164_v37 }
 0x118   :  { %v172_v40 = vadd.f32 %v171_v38, %v170_v39 }
 0x11a   :  { %v175_v41 = vmax.f32 %v172_v40, 0.0 }
 0x11b   :  { %v162_v42 = vpop.f32.mrf.mxu1 }
 0x11c   :  { %v176_v43 = vpack.c.bf16 %v175_v41, %v175_v41 }
 0x11e   :  { %253 = vmatmul.bf16.vlgmr.msra.gmra.mxu2 %v176_v43 }
 0x1a1   :  { %v254_v45 = vpop.f32.mrf.mxu2 }
 0x1a2   :  { %v255_v46 = vadd.f32 %v367_v44, %v254_v45 }
 0x1a4   :  { %259 = vst.msk [vmem:[#allocation5] sm:$0x3] %vm258_vm2, %v255_v46 }
 0x1a5   :  { %270 = dma.vmem_to_hbm [thread:$0]  %s266_s19, 32, %s268_s4, [#allocation4]  }
 0x1a9   :  { %v256_v47 = vpop.f32.mrf.mxu2 }
 0x1aa   :  { %418 = dma.done.wait [#allocation4], 32  }
 0x1ab   :  { %419 = vsyncadd [#allocation4], 4294967264 }
 0x1ac   :  { %275 = vsyncpa [#allocation3], 1 }
 0x1ad   :  { %276 = vsyncpa [#allocation4], 1 }

</bundles_post_ra>
